<compile_context>
chip_gen: v5e
topology: v5e:2x2
jax: 0.10.0
libtpu: 0.0.40
codegen_flags: <defaults>
</compile_context>

<pallas_src>
import functools

import jax
import jax.numpy as jnp
from jax.experimental import pallas as pl
from jax.experimental.pallas import tpu as pltpu

EPS = 1e-12  # matches torch.nn.functional.normalize default eps


def _netvlad_kernel(cent_ref, x_ref, o_ref, v_acc, a_acc, *, alpha, block_b,
                    matmul_dtype, normalize_input):
    # cent_ref: (K, C)             centroids (only parameter input)
    # x_ref:    (block_b, C, St)   S-tile of block_b samples, channel-major
    # o_ref:    (block_b, K, C)    normalized VLAD descriptors
    # v_acc:    (block_b, K, C)    f32 accumulator for sum_s a[k,s]*xn[c,s]
    # a_acc:    (block_b, K, 1)    f32 accumulator for sum_s a[k,s]
    s_idx = pl.program_id(1)
    last_s = pl.num_programs(1) - 1

    @pl.when(s_idx == 0)
    def _init():
        v_acc[...] = jnp.zeros_like(v_acc)
        a_acc[...] = jnp.zeros_like(a_acc)

    cent = cent_ref[...].astype(jnp.float32)                          # (K, C)
    # conv-1x1 parameters reconstructed from centroids, exactly as in
    # NetVLAD._init_params (saves two parameter DMAs / VMEM buffers).
    w = (2.0 * alpha) * cent                                          # (K, C)
    bias = (-alpha) * jnp.sqrt(jnp.sum(cent * cent, axis=1, keepdims=True))
    w_mm = w.astype(matmul_dtype)

    for b in range(block_b):                                          # static unroll
        x = x_ref[b].astype(jnp.float32)                              # (C, St)

        # 1) descriptor-wise L2 normalization over channels (optional).
        if normalize_input:
            inv_n = jax.lax.rsqrt(
                jnp.maximum(jnp.sum(x * x, axis=0, keepdims=True), EPS * EPS))
            xn = x * inv_n                                            # (C, St)
        else:
            xn = x
        xn_mm = xn.astype(matmul_dtype)

        # 2) 1x1 conv == matmul: logits[k, s] = sum_c w[k,c] * xn[c,s] + b[k]
        logits = jax.lax.dot_general(
            w_mm, xn_mm, (((1,), (0,)), ((), ())),
            preferred_element_type=jnp.float32) + bias                # (K, St)

        # 3) softmax over clusters (sublane axis).
        m = jnp.max(logits, axis=0, keepdims=True)                    # (1, St)
        e = jnp.exp(logits - m)
        a = e * pl.reciprocal(jnp.sum(e, axis=0, keepdims=True), approx=True)

        # 4) accumulate  sum_s a[k,s]*xn[c,s]  (single MXU matmul, NT form)
        #    and  sum_s a[k,s]  (lane reduction -- no second matmul).
        v_acc[b] += jax.lax.dot_general(
            a.astype(matmul_dtype), xn_mm, (((1,), (1,)), ((), ())),
            preferred_element_type=jnp.float32)                       # (K, C)
        a_acc[b] += jnp.sum(a, axis=1, keepdims=True)                 # (K, 1)

    @pl.when(s_idx == last_s)
    def _finalize():
        for b in range(block_b):                                      # static unroll
            v = v_acc[b] - cent * a_acc[b]                            # (K, C)
            # 5a) intra-normalization: L2 over C per cluster.
            v = v * jax.lax.rsqrt(
                jnp.maximum(jnp.sum(v * v, axis=1, keepdims=True), EPS * EPS))
            # 5b) global L2 over the flattened (K*C) descriptor.
            g = jnp.sum(jnp.sum(v * v, axis=1, keepdims=True), axis=0,
                        keepdims=True)                                # (1, 1)
            v = v * jax.lax.rsqrt(jnp.maximum(g, EPS * EPS))
            o_ref[b] = v.astype(o_ref.dtype)


def _auto_block_s(s):
    """Largest convenient S-tile: whole S unless very large."""
    if s <= 4096:
        return s
    for cand in (4096, 2048, 1024, 512, 256, 128):
        if s % cand == 0:
            return cand
    return s  # no clean 128-multiple divisor; fall back to whole extent


def _auto_block_b(n, c, k, s_tile, budget_bytes=32 << 20):
    """Pick the largest batch-block that fits a conservative VMEM budget
    (double-buffered x / out / centroid blocks + f32 accumulators)."""
    for bb in (16, 8, 4, 2, 1):
        if n % bb:
            continue
        need = 4 * (2 * k * c                      # centroids (double-buffered)
                    + 2 * bb * c * s_tile          # x block (double-buffered)
                    + 2 * bb * k * c               # out block (double-buffered)
                    + bb * k * c                   # v_acc scratch
                    + bb * k * 128)                # a_acc scratch (lane-padded)
        if need <= budget_bytes:
            return bb
    return 1


def netvlad_pallas(x_nchw, centroids, alpha, *, block_b=None, block_s=None,
                   matmul_dtype=jnp.float32, normalize_input=True):
    """NetVLAD forward. x_nchw: (N, C, H, W). Returns (N, K*C) float32.

    matmul_dtype=jnp.bfloat16 can be passed on v6e/v7x to halve MXU-operand
    bytes (stats/normalizations stay f32).
    """
    n, c, h, w = x_nchw.shape
    k = centroids.shape[0]
    s = h * w

    if block_s is None:
        block_s = _auto_block_s(s)
    assert block_s == s or (s % block_s == 0 and block_s % 128 == 0), (
        "block_s must equal S or be a 128-multiple dividing S")
    if block_b is None:
        block_b = _auto_block_b(n, c, k, block_s)
    assert n % block_b == 0, "batch must be divisible by block_b"

    # Free metadata reshape (trailing-dims collapse): NCHW -> (N, C, S).
    # No transpose, no extra HBM pass.
    x_cs = x_nchw.reshape(n, c, s)

    kernel = functools.partial(
        _netvlad_kernel, alpha=float(alpha), block_b=block_b,
        matmul_dtype=matmul_dtype, normalize_input=bool(normalize_input))

    out = pl.pallas_call(
        kernel,
        out_shape=jax.ShapeDtypeStruct((n, k, c), jnp.float32),
        grid_spec=pltpu.PrefetchScalarGridSpec(
            num_scalar_prefetch=0,
            grid=(n // block_b, s // block_s),
            in_specs=[
                pl.BlockSpec((k, c), lambda i, si: (0, 0)),
                pl.BlockSpec((block_b, c, block_s), lambda i, si: (i, 0, si)),
            ],
            out_specs=pl.BlockSpec((block_b, k, c), lambda i, si: (i, 0, 0)),
            scratch_shapes=[
                pltpu.VMEM((block_b, k, c), jnp.float32),
                pltpu.VMEM((block_b, k, 1), jnp.float32),
            ],
        ),
        compiler_params=pltpu.CompilerParams(
            dimension_semantics=("parallel", "arbitrary"),
        ),
    )(centroids.astype(jnp.float32), x_cs)

    # Trailing-dims collapse: free in XLA (no extra HBM pass).
    return out.reshape(n, k * c)


def netvlad_reference(x_nchw, centroids, alpha, normalize_input=True):
    """Pure-JAX re-statement of the PyTorch forward for validation."""
    n, c, h, w = x_nchw.shape
    k = centroids.shape[0]
    x = x_nchw.astype(jnp.float32)
    if normalize_input:
        x = x / jnp.maximum(jnp.linalg.norm(x, axis=1, keepdims=True), EPS)
    xf = x.reshape(n, c, h * w)                                   # (N, C, S)
    conv_w = 2.0 * alpha * centroids                              # (K, C)
    conv_b = -alpha * jnp.linalg.norm(centroids, axis=1)          # (K,)
    logits = jnp.einsum("kc,ncs->nks", conv_w, xf) + conv_b[None, :, None]
    a = jax.nn.softmax(logits, axis=1)                            # (N, K, S)
    resid = xf[:, None, :, :] - centroids[None, :, :, None]       # (N, K, C, S)
    vlad = jnp.sum(resid * a[:, :, None, :], axis=-1)             # (N, K, C)
    vlad = vlad / jnp.maximum(jnp.linalg.norm(vlad, axis=2, keepdims=True), EPS)
    vlad = vlad.reshape(n, k * c)
    vlad = vlad / jnp.maximum(jnp.linalg.norm(vlad, axis=1, keepdims=True), EPS)
    return vlad


if __name__ == "__main__":
    # small shapes consistent with the module: batch=2, dim=32, clusters=16, 8x8 spatial
    N, C, H, W = 2, 32, 8, 8
    K = 16
    ALPHA = 100.0

    key = jax.random.PRNGKey(0)
    kx, kc = jax.random.split(key)
    x = jax.random.normal(kx, (N, C, H, W), dtype=jnp.float32)
    # torch.rand -> uniform [0, 1)
    centroids = jax.random.uniform(kc, (K, C), dtype=jnp.float32)

    out = netvlad_pallas(x, centroids, ALPHA)
    out = jax.block_until_ready(out)

    ref = netvlad_reference(x, centroids, ALPHA)
    assert out.shape == (N, K * C)
    # Tolerance is slightly looser than pure-f32 because the softmax
    # denominator uses the EUP approximate reciprocal (approx=True).
    assert jnp.allclose(out, ref, rtol=2e-3, atol=1e-3), (
        f"mismatch vs reference, max abs err = "
        f"{float(jnp.max(jnp.abs(out - ref)))}")

    print("KERNEL_OK")
</pallas_src>

<mosaic_0001>
module attributes {stable_mosaic.version = 11 : i64} {
  func.func @_netvlad_kernel(%arg0: i32, %arg1: i32, %arg2: memref<16x32xf32, #tpu.memory_space<vmem>>, %arg3: memref<2x32x64xf32, #tpu.memory_space<vmem>>, %arg4: memref<2x16x32xf32, #tpu.memory_space<vmem>>, %arg5: memref<2x16x32xf32, #tpu.memory_space<vmem>>, %arg6: memref<2x16x1xf32, #tpu.memory_space<vmem>>) attributes {dimension_semantics = [#tpu.dimension_semantics<parallel>, #tpu.dimension_semantics<arbitrary>], iteration_bounds = array<i64: 1, 1>, scalar_prefetch = 0 : i64, scratch_operands = 2 : i64, tpu.core_type = #tpu.core_type<tc>, window_params = [{pipeline_mode = #tpu.pipeline_mode<synchronous>, transform_indices = @transform_0, window_bounds = array<i64: 16, 32>}, {transform_indices = @transform_1, window_bounds = array<i64: 2, 32, 64>}, {transform_indices = @transform_2, window_bounds = array<i64: 2, 16, 32>}]} {
    %c0_i32 = arith.constant 0 : i32
    %0 = arith.cmpi eq, %arg1, %c0_i32 : i32
    %1 = arith.extui %0 : i1 to i32
    %c0_i32_0 = arith.constant 0 : i32
    %2 = arith.cmpi ne, %1, %c0_i32_0 : i32
    scf.if %2 {
      %cst_49 = arith.constant 0.000000e+00 : f32
      %91 = vector.broadcast %cst_49 : f32 to vector<2x16x32xf32>
      %c0_50 = arith.constant 0 : index
      %c0_51 = arith.constant 0 : index
      %c0_52 = arith.constant 0 : index
      %92 = vector.load %arg5[%c0_50, %c0_51, %c0_52] : memref<2x16x32xf32, #tpu.memory_space<vmem>>, vector<2x16x32xf32>
      tpu.vector_store %arg5[%c0_50, %c0_51, %c0_52], %91 {strides = array<i32>} : memref<2x16x32xf32, #tpu.memory_space<vmem>>, vector<2x16x32xf32>,
      %cst_53 = arith.constant 0.000000e+00 : f32
      %93 = vector.broadcast %cst_53 : f32 to vector<2x16x1xf32>
      %c0_54 = arith.constant 0 : index
      %c0_55 = arith.constant 0 : index
      %c0_56 = arith.constant 0 : index
      %94 = vector.load %arg6[%c0_54, %c0_55, %c0_56] : memref<2x16x1xf32, #tpu.memory_space<vmem>>, vector<2x16x1xf32>
      tpu.vector_store %arg6[%c0_54, %c0_55, %c0_56], %93 {strides = array<i32>} : memref<2x16x1xf32, #tpu.memory_space<vmem>>, vector<2x16x1xf32>,
    } else {
    }
    %c0 = arith.constant 0 : index
    %c0_1 = arith.constant 0 : index
    %3 = vector.load %arg2[%c0, %c0_1] : memref<16x32xf32, #tpu.memory_space<vmem>>, vector<16x32xf32>
    %cst = arith.constant 2.000000e+02 : f32
    %4 = vector.broadcast %cst : f32 to vector<16x32xf32>
    %5 = arith.mulf %4, %3 : vector<16x32xf32>
    %6 = arith.mulf %3, %3 : vector<16x32xf32>
    %cst_2 = arith.constant dense<0.000000e+00> : vector<16xf32>
    %7 = vector.multi_reduction <add>, %6, %cst_2 [1] : vector<16x32xf32> to vector<16xf32>
    %8 = vector.shape_cast %7 : vector<16xf32> to vector<16x1xf32>
    %9 = math.sqrt %8 : vector<16x1xf32>
    %cst_3 = arith.constant -1.000000e+02 : f32
    %10 = vector.broadcast %cst_3 : f32 to vector<16x1xf32>
    %11 = arith.mulf %10, %9 : vector<16x1xf32>
    %c0_4 = arith.constant 0 : index
    %c0_5 = arith.constant 0 : index
    %c0_6 = arith.constant 0 : index
    %12 = vector.load %arg3[%c0_4, %c0_5, %c0_6] : memref<2x32x64xf32, #tpu.memory_space<vmem>>, vector<1x32x64xf32>
    %13 = vector.shape_cast %12 : vector<1x32x64xf32> to vector<32x64xf32>
    %14 = arith.mulf %13, %13 : vector<32x64xf32>
    %cst_7 = arith.constant dense<0.000000e+00> : vector<64xf32>
    %15 = vector.multi_reduction <add>, %14, %cst_7 [0] : vector<32x64xf32> to vector<64xf32>
    %16 = vector.shape_cast %15 : vector<64xf32> to vector<1x64xf32>
    %cst_8 = arith.constant 1.000000e-24 : f32
    %17 = vector.broadcast %cst_8 : f32 to vector<1x64xf32>
    %18 = arith.maximumf %16, %17 : vector<1x64xf32>
    %19 = math.rsqrt %18 : vector<1x64xf32>
    %20 = vector.broadcast %19 : vector<1x64xf32> to vector<32x64xf32>
    %21 = arith.mulf %13, %20 : vector<32x64xf32>
    %cst_9 = arith.constant dense<0.000000e+00> : vector<16x64xf32>
    %22 = tpu.matmul %5, %21, %cst_9 {dimension_numbers = #tpu.dot_dimension_numbers<[1], [0], [0], [1], [0, 0, 1, 1], [], []>} : vector<16x32xf32>, vector<32x64xf32>, vector<16x64xf32> -> vector<16x64xf32>
    %23 = vector.broadcast %11 : vector<16x1xf32> to vector<16x64xf32>
    %24 = arith.addf %22, %23 : vector<16x64xf32>
    %cst_10 = arith.constant dense<0xFF800000> : vector<64xf32>
    %25 = vector.multi_reduction <maximumf>, %24, %cst_10 [0] : vector<16x64xf32> to vector<64xf32>
    %26 = vector.shape_cast %25 : vector<64xf32> to vector<1x64xf32>
    %27 = vector.broadcast %26 : vector<1x64xf32> to vector<16x64xf32>
    %28 = arith.subf %24, %27 : vector<16x64xf32>
    %29 = math.exp %28 : vector<16x64xf32>
    %cst_11 = arith.constant dense<0.000000e+00> : vector<64xf32>
    %30 = vector.multi_reduction <add>, %29, %cst_11 [0] : vector<16x64xf32> to vector<64xf32>
    %31 = vector.shape_cast %30 : vector<64xf32> to vector<1x64xf32>
    %32 = tpu.reciprocal %31 {approx = true} : vector<1x64xf32> -> vector<1x64xf32>
    %33 = vector.broadcast %32 : vector<1x64xf32> to vector<16x64xf32>
    %34 = arith.mulf %29, %33 : vector<16x64xf32>
    %c0_12 = arith.constant 0 : index
    %c0_13 = arith.constant 0 : index
    %c0_14 = arith.constant 0 : index
    %35 = vector.load %arg5[%c0_12, %c0_13, %c0_14] : memref<2x16x32xf32, #tpu.memory_space<vmem>>, vector<1x16x32xf32>
    %36 = vector.shape_cast %35 : vector<1x16x32xf32> to vector<16x32xf32>
    %cst_15 = arith.constant dense<0.000000e+00> : vector<16x32xf32>
    %37 = tpu.matmul %34, %21, %cst_15 {dimension_numbers = #tpu.dot_dimension_numbers<[1], [1], [0], [0], [0, 0, 1, 0], [], []>} : vector<16x64xf32>, vector<32x64xf32>, vector<16x32xf32> -> vector<16x32xf32>
    %38 = arith.addf %36, %37 : vector<16x32xf32>
    %c0_16 = arith.constant 0 : index
    %c0_17 = arith.constant 0 : index
    %c0_18 = arith.constant 0 : index
    %39 = vector.load %arg5[%c0_16, %c0_17, %c0_18] : memref<2x16x32xf32, #tpu.memory_space<vmem>>, vector<1x16x32xf32>
    %40 = vector.shape_cast %39 : vector<1x16x32xf32> to vector<16x32xf32>
    %41 = vector.shape_cast %38 : vector<16x32xf32> to vector<1x16x32xf32>
    tpu.vector_store %arg5[%c0_16, %c0_17, %c0_18], %41 {strides = array<i32>} : memref<2x16x32xf32, #tpu.memory_space<vmem>>, vector<1x16x32xf32>,
    %c0_19 = arith.constant 0 : index
    %c0_20 = arith.constant 0 : index
    %c0_21 = arith.constant 0 : index
    %42 = vector.load %arg6[%c0_19, %c0_20, %c0_21] : memref<2x16x1xf32, #tpu.memory_space<vmem>>, vector<1x16x1xf32>
    %43 = vector.shape_cast %42 : vector<1x16x1xf32> to vector<16x1xf32>
    %cst_22 = arith.constant dense<0.000000e+00> : vector<16xf32>
    %44 = vector.multi_reduction <add>, %34, %cst_22 [1] : vector<16x64xf32> to vector<16xf32>
    %45 = vector.shape_cast %44 : vector<16xf32> to vector<16x1xf32>
    %46 = arith.addf %43, %45 : vector<16x1xf32>
    %c0_23 = arith.constant 0 : index
    %c0_24 = arith.constant 0 : index
    %c0_25 = arith.constant 0 : index
    %47 = vector.load %arg6[%c0_23, %c0_24, %c0_25] : memref<2x16x1xf32, #tpu.memory_space<vmem>>, vector<1x16x1xf32>
    %48 = vector.shape_cast %47 : vector<1x16x1xf32> to vector<16x1xf32>
    %49 = vector.shape_cast %46 : vector<16x1xf32> to vector<1x16x1xf32>
    tpu.vector_store %arg6[%c0_23, %c0_24, %c0_25], %49 {strides = array<i32>} : memref<2x16x1xf32, #tpu.memory_space<vmem>>, vector<1x16x1xf32>,
    %c1 = arith.constant 1 : index
    %c0_26 = arith.constant 0 : index
    %c0_27 = arith.constant 0 : index
    %50 = vector.load %arg3[%c1, %c0_26, %c0_27] : memref<2x32x64xf32, #tpu.memory_space<vmem>>, vector<1x32x64xf32>
    %51 = vector.shape_cast %50 : vector<1x32x64xf32> to vector<32x64xf32>
    %52 = arith.mulf %51, %51 : vector<32x64xf32>
    %cst_28 = arith.constant dense<0.000000e+00> : vector<64xf32>
    %53 = vector.multi_reduction <add>, %52, %cst_28 [0] : vector<32x64xf32> to vector<64xf32>
    %54 = vector.shape_cast %53 : vector<64xf32> to vector<1x64xf32>
    %cst_29 = arith.constant 1.000000e-24 : f32
    %55 = vector.broadcast %cst_29 : f32 to vector<1x64xf32>
    %56 = arith.maximumf %54, %55 : vector<1x64xf32>
    %57 = math.rsqrt %56 : vector<1x64xf32>
    %58 = vector.broadcast %57 : vector<1x64xf32> to vector<32x64xf32>
    %59 = arith.mulf %51, %58 : vector<32x64xf32>
    %cst_30 = arith.constant dense<0.000000e+00> : vector<16x64xf32>
    %60 = tpu.matmul %5, %59, %cst_30 {dimension_numbers = #tpu.dot_dimension_numbers<[1], [0], [0], [1], [0, 0, 1, 1], [], []>} : vector<16x32xf32>, vector<32x64xf32>, vector<16x64xf32> -> vector<16x64xf32>
    %61 = vector.broadcast %11 : vector<16x1xf32> to vector<16x64xf32>
    %62 = arith.addf %60, %61 : vector<16x64xf32>
    %cst_31 = arith.constant dense<0xFF800000> : vector<64xf32>
    %63 = vector.multi_reduction <maximumf>, %62, %cst_31 [0] : vector<16x64xf32> to vector<64xf32>
    %64 = vector.shape_cast %63 : vector<64xf32> to vector<1x64xf32>
    %65 = vector.broadcast %64 : vector<1x64xf32> to vector<16x64xf32>
    %66 = arith.subf %62, %65 : vector<16x64xf32>
    %67 = math.exp %66 : vector<16x64xf32>
    %cst_32 = arith.constant dense<0.000000e+00> : vector<64xf32>
    %68 = vector.multi_reduction <add>, %67, %cst_32 [0] : vector<16x64xf32> to vector<64xf32>
    %69 = vector.shape_cast %68 : vector<64xf32> to vector<1x64xf32>
    %70 = tpu.reciprocal %69 {approx = true} : vector<1x64xf32> -> vector<1x64xf32>
    %71 = vector.broadcast %70 : vector<1x64xf32> to vector<16x64xf32>
    %72 = arith.mulf %67, %71 : vector<16x64xf32>
    %c1_33 = arith.constant 1 : index
    %c0_34 = arith.constant 0 : index
    %c0_35 = arith.constant 0 : index
    %73 = vector.load %arg5[%c1_33, %c0_34, %c0_35] : memref<2x16x32xf32, #tpu.memory_space<vmem>>, vector<1x16x32xf32>
    %74 = vector.shape_cast %73 : vector<1x16x32xf32> to vector<16x32xf32>
    %cst_36 = arith.constant dense<0.000000e+00> : vector<16x32xf32>
    %75 = tpu.matmul %72, %59, %cst_36 {dimension_numbers = #tpu.dot_dimension_numbers<[1], [1], [0], [0], [0, 0, 1, 0], [], []>} : vector<16x64xf32>, vector<32x64xf32>, vector<16x32xf32> -> vector<16x32xf32>
    %76 = arith.addf %74, %75 : vector<16x32xf32>
    %c1_37 = arith.constant 1 : index
    %c0_38 = arith.constant 0 : index
    %c0_39 = arith.constant 0 : index
    %77 = vector.load %arg5[%c1_37, %c0_38, %c0_39] : memref<2x16x32xf32, #tpu.memory_space<vmem>>, vector<1x16x32xf32>
    %78 = vector.shape_cast %77 : vector<1x16x32xf32> to vector<16x32xf32>
    %79 = vector.shape_cast %76 : vector<16x32xf32> to vector<1x16x32xf32>
    tpu.vector_store %arg5[%c1_37, %c0_38, %c0_39], %79 {strides = array<i32>} : memref<2x16x32xf32, #tpu.memory_space<vmem>>, vector<1x16x32xf32>,
    %c1_40 = arith.constant 1 : index
    %c0_41 = arith.constant 0 : index
    %c0_42 = arith.constant 0 : index
    %80 = vector.load %arg6[%c1_40, %c0_41, %c0_42] : memref<2x16x1xf32, #tpu.memory_space<vmem>>, vector<1x16x1xf32>
    %81 = vector.shape_cast %80 : vector<1x16x1xf32> to vector<16x1xf32>
    %cst_43 = arith.constant dense<0.000000e+00> : vector<16xf32>
    %82 = vector.multi_reduction <add>, %72, %cst_43 [1] : vector<16x64xf32> to vector<16xf32>
    %83 = vector.shape_cast %82 : vector<16xf32> to vector<16x1xf32>
    %84 = arith.addf %81, %83 : vector<16x1xf32>
    %c1_44 = arith.constant 1 : index
    %c0_45 = arith.constant 0 : index
    %c0_46 = arith.constant 0 : index
    %85 = vector.load %arg6[%c1_44, %c0_45, %c0_46] : memref<2x16x1xf32, #tpu.memory_space<vmem>>, vector<1x16x1xf32>
    %86 = vector.shape_cast %85 : vector<1x16x1xf32> to vector<16x1xf32>
    %87 = vector.shape_cast %84 : vector<16x1xf32> to vector<1x16x1xf32>
    tpu.vector_store %arg6[%c1_44, %c0_45, %c0_46], %87 {strides = array<i32>} : memref<2x16x1xf32, #tpu.memory_space<vmem>>, vector<1x16x1xf32>,
    %c0_i32_47 = arith.constant 0 : i32
    %88 = arith.cmpi eq, %arg1, %c0_i32_47 : i32
    %89 = arith.extui %88 : i1 to i32
    %c0_i32_48 = arith.constant 0 : i32
    %90 = arith.cmpi ne, %89, %c0_i32_48 : i32
    scf.if %90 {
      %c0_49 = arith.constant 0 : index
      %c0_50 = arith.constant 0 : index
      %c0_51 = arith.constant 0 : index
      %91 = vector.load %arg5[%c0_49, %c0_50, %c0_51] : memref<2x16x32xf32, #tpu.memory_space<vmem>>, vector<1x16x32xf32>
      %92 = vector.shape_cast %91 : vector<1x16x32xf32> to vector<16x32xf32>
      %c0_52 = arith.constant 0 : index
      %c0_53 = arith.constant 0 : index
      %c0_54 = arith.constant 0 : index
      %93 = vector.load %arg6[%c0_52, %c0_53, %c0_54] : memref<2x16x1xf32, #tpu.memory_space<vmem>>, vector<1x16x1xf32>
      %94 = vector.shape_cast %93 : vector<1x16x1xf32> to vector<16x1xf32>
      %95 = vector.broadcast %94 : vector<16x1xf32> to vector<16x32xf32>
      %96 = arith.mulf %3, %95 : vector<16x32xf32>
      %97 = arith.subf %92, %96 : vector<16x32xf32>
      %98 = arith.mulf %97, %97 : vector<16x32xf32>
      %cst_55 = arith.constant dense<0.000000e+00> : vector<16xf32>
      %99 = vector.multi_reduction <add>, %98, %cst_55 [1] : vector<16x32xf32> to vector<16xf32>
      %100 = vector.shape_cast %99 : vector<16xf32> to vector<16x1xf32>
      %cst_56 = arith.constant 1.000000e-24 : f32
      %101 = vector.broadcast %cst_56 : f32 to vector<16x1xf32>
      %102 = arith.maximumf %100, %101 : vector<16x1xf32>
      %103 = math.rsqrt %102 : vector<16x1xf32>
      %104 = vector.broadcast %103 : vector<16x1xf32> to vector<16x32xf32>
      %105 = arith.mulf %97, %104 : vector<16x32xf32>
      %106 = arith.mulf %105, %105 : vector<16x32xf32>
      %cst_57 = arith.constant dense<0.000000e+00> : vector<16xf32>
      %107 = vector.multi_reduction <add>, %106, %cst_57 [1] : vector<16x32xf32> to vector<16xf32>
      %108 = vector.shape_cast %107 : vector<16xf32> to vector<16x1xf32>
      %cst_58 = arith.constant dense<0.000000e+00> : vector<1xf32>
      %109 = vector.multi_reduction <add>, %108, %cst_58 [0] : vector<16x1xf32> to vector<1xf32>
      %110 = vector.shape_cast %109 : vector<1xf32> to vector<1x1xf32>
      %cst_59 = arith.constant 1.000000e-24 : f32
      %111 = vector.broadcast %cst_59 : f32 to vector<1x1xf32>
      %112 = arith.maximumf %110, %111 : vector<1x1xf32>
      %113 = math.rsqrt %112 : vector<1x1xf32>
      %114 = vector.broadcast %113 : vector<1x1xf32> to vector<16x32xf32>
      %115 = arith.mulf %105, %114 : vector<16x32xf32>
      %c0_60 = arith.constant 0 : index
      %c0_61 = arith.constant 0 : index
      %c0_62 = arith.constant 0 : index
      %116 = vector.load %arg4[%c0_60, %c0_61, %c0_62] : memref<2x16x32xf32, #tpu.memory_space<vmem>>, vector<1x16x32xf32>
      %117 = vector.shape_cast %116 : vector<1x16x32xf32> to vector<16x32xf32>
      %118 = vector.shape_cast %115 : vector<16x32xf32> to vector<1x16x32xf32>
      tpu.vector_store %arg4[%c0_60, %c0_61, %c0_62], %118 {strides = array<i32>} : memref<2x16x32xf32, #tpu.memory_space<vmem>>, vector<1x16x32xf32>,
      %c1_63 = arith.constant 1 : index
      %c0_64 = arith.constant 0 : index
      %c0_65 = arith.constant 0 : index
      %119 = vector.load %arg5[%c1_63, %c0_64, %c0_65] : memref<2x16x32xf32, #tpu.memory_space<vmem>>, vector<1x16x32xf32>
      %120 = vector.shape_cast %119 : vector<1x16x32xf32> to vector<16x32xf32>
      %c1_66 = arith.constant 1 : index
      %c0_67 = arith.constant 0 : index
      %c0_68 = arith.constant 0 : index
      %121 = vector.load %arg6[%c1_66, %c0_67, %c0_68] : memref<2x16x1xf32, #tpu.memory_space<vmem>>, vector<1x16x1xf32>
      %122 = vector.shape_cast %121 : vector<1x16x1xf32> to vector<16x1xf32>
      %123 = vector.broadcast %122 : vector<16x1xf32> to vector<16x32xf32>
      %124 = arith.mulf %3, %123 : vector<16x32xf32>
      %125 = arith.subf %120, %124 : vector<16x32xf32>
      %126 = arith.mulf %125, %125 : vector<16x32xf32>
      %cst_69 = arith.constant dense<0.000000e+00> : vector<16xf32>
      %127 = vector.multi_reduction <add>, %126, %cst_69 [1] : vector<16x32xf32> to vector<16xf32>
      %128 = vector.shape_cast %127 : vector<16xf32> to vector<16x1xf32>
      %cst_70 = arith.constant 1.000000e-24 : f32
      %129 = vector.broadcast %cst_70 : f32 to vector<16x1xf32>
      %130 = arith.maximumf %128, %129 : vector<16x1xf32>
      %131 = math.rsqrt %130 : vector<16x1xf32>
      %132 = vector.broadcast %131 : vector<16x1xf32> to vector<16x32xf32>
      %133 = arith.mulf %125, %132 : vector<16x32xf32>
      %134 = arith.mulf %133, %133 : vector<16x32xf32>
      %cst_71 = arith.constant dense<0.000000e+00> : vector<16xf32>
      %135 = vector.multi_reduction <add>, %134, %cst_71 [1] : vector<16x32xf32> to vector<16xf32>
      %136 = vector.shape_cast %135 : vector<16xf32> to vector<16x1xf32>
      %cst_72 = arith.constant dense<0.000000e+00> : vector<1xf32>
      %137 = vector.multi_reduction <add>, %136, %cst_72 [0] : vector<16x1xf32> to vector<1xf32>
      %138 = vector.shape_cast %137 : vector<1xf32> to vector<1x1xf32>
      %cst_73 = arith.constant 1.000000e-24 : f32
      %139 = vector.broadcast %cst_73 : f32 to vector<1x1xf32>
      %140 = arith.maximumf %138, %139 : vector<1x1xf32>
      %141 = math.rsqrt %140 : vector<1x1xf32>
      %142 = vector.broadcast %141 : vector<1x1xf32> to vector<16x32xf32>
      %143 = arith.mulf %133, %142 : vector<16x32xf32>
      %c1_74 = arith.constant 1 : index
      %c0_75 = arith.constant 0 : index
      %c0_76 = arith.constant 0 : index
      %144 = vector.load %arg4[%c1_74, %c0_75, %c0_76] : memref<2x16x32xf32, #tpu.memory_space<vmem>>, vector<1x16x32xf32>
      %145 = vector.shape_cast %144 : vector<1x16x32xf32> to vector<16x32xf32>
      %146 = vector.shape_cast %143 : vector<16x32xf32> to vector<1x16x32xf32>
      tpu.vector_store %arg4[%c1_74, %c0_75, %c0_76], %146 {strides = array<i32>} : memref<2x16x32xf32, #tpu.memory_space<vmem>>, vector<1x16x32xf32>,
    } else {
    }
    return
  }
  func.func @transform_0(%arg0: i32, %arg1: i32) -> (i32, i32) {
    %c0_i32 = arith.constant 0 : i32
    %c0_i32_0 = arith.constant 0 : i32
    %c0_i32_1 = arith.constant 0 : i32
    return %c0_i32, %c0_i32_0 : i32, i32
  }
  func.func @transform_1(%arg0: i32, %arg1: i32) -> (i32, i32, i32) {
    %c0_i32 = arith.constant 0 : i32
    %c0_i32_0 = arith.constant 0 : i32
    return %arg0, %c0_i32, %arg1 : i32, i32, i32
  }
  func.func @transform_2(%arg0: i32, %arg1: i32) -> (i32, i32, i32) {
    %c0_i32 = arith.constant 0 : i32
    %c0_i32_0 = arith.constant 0 : i32
    %c0_i32_1 = arith.constant 0 : i32
    return %arg0, %c0_i32, %c0_i32_0 : i32, i32, i32
  }
}

</mosaic_0001>

<bundles_post_ra>
// kernel: tpu_custom_call.1
= control target key start
LH: loop header
LB: loop body
LE: loop exit
PB: predicated region body
PF: predicated region fallthrough
CT: control target
= control target key end

     0   :  { %7 = vsyncpa [#allocation5], 0  ;;  %s893_s0 = inlined_call_operand.hbm [shape: f32[16,32], index: 0, kind: input, shape index: {}]   ;;  %s894_s1 = inlined_call_operand.hbm [shape: f32[2,32,64], index: 1, kind: input, shape index: {}]   ;;  %s895_s2 = inlined_call_operand.hbm [shape: f32[2,16,32], index: 2, kind: output, shape index: {}]  }
   0x1   :  { %8 = vsyncpa [#allocation8], 0 }
   0x2   :  { %9 = vsyncpa [#allocation6], 0  ;;  %s14_s11 = sshll.u32 %s893_s0, 4  ;;  %s718_s12 = smov [#allocation4]   ;;  %s15_s11 = int_to_ptr.hbm [resolvable:$true] %s14_s11 }
   0x3   :  { %s16_s13 = sshll.u32 %s718_s12, 4  ;;  %s27_s16 = sshll.u32 %s894_s1, 4  ;;  %s17_s13 = int_to_ptr.vmem [resolvable:$true] %s16_s13  ;;  %s28_s16 = int_to_ptr.hbm [resolvable:$true] %s27_s16 }
   0x4   :  { %s719_s17 = smov 128   ;;  %s720_s18 = smov 8  }
   0x5   :  { %22 = dma.hbm_to_vmem [thread:$0]  %s15_s11, 256, %s17_s13, [#allocation5], %s719_s17, %s719_s17, %s720_s18  }
   0x6   :  { %s721_s19 = smov [#allocation7]  }
   0x7   :  { %s29_s20 = sshll.u32 %s721_s19, 4  ;;  %s30_s20 = int_to_ptr.vmem [resolvable:$true] %s29_s20 }
   0x8   :  { %35 = dma.hbm_to_vmem [thread:$0]  %s28_s16, 1024, %s30_s20, [#allocation8], %s719_s17, %s719_s17, %s720_s18  }
   0x9   :  { %712 = dma.done.wait [#allocation5], 256  }
   0xa   :  { %713 = vsyncadd [#allocation5], 4294967040 }
   0xb   :  { %714 = dma.done.wait [#allocation8], 1024  }
   0xc   :  { %715 = vsyncadd [#allocation8], 4294966272  ;;  %vm48_vm0 = vcmask 261120   ;;  %v752_v0 = vld [vmem:[#allocation4] sm:$0xff]  ;;  %v754_v1 = vld [vmem:[#allocation4 + $0x8] sm:$0xff]  ;;  %vm105_vm1 = vcmask 523264  }
   0xd   :  { %v756_v2 = vld [vmem:[#allocation7] sm:$0xff]  ;;  %v62_v3 = vmul.f32 %v752_v0, %v752_v0  ;;  %v760_v4 = vld [vmem:[#allocation7 + $0x8] sm:$0xff]  ;;  %v762_v5 = vld [vmem:[#allocation7 + $0x10] sm:$0xff]  ;;  %v63_v18 = vmul.f32 %v754_v1, %v754_v1  ;;  %vm53_vm12 = vcmask 7168   ;;  %s724_s0 = smov [#allocation9]   ;;  %s568_s23 = sshll.u32 %s895_s2, 4  ;;  %s569_s23 = int_to_ptr.hbm [resolvable:$true] %s568_s23 }
   0xe   :  { %v764_v6 = vld [vmem:[#allocation7 + $0x18] sm:$0xff]  ;;  %v101_v7 = vmul.f32 %v756_v2, %v756_v2  ;;  %v102_v8 = vmul.f32 %v760_v4, %v760_v4  ;;  %v103_v9 = vmul.f32 %v762_v5, %v762_v5  ;;  %v774_v11 = vld [vmem:[#allocation7 + $0x20] sm:$0xff]  ;;  %v776_v12 = vld [vmem:[#allocation7 + $0x28] sm:$0xff]  ;;  %s566_s1 = sshll.u32 %s724_s0, 4  ;;  %s567_s1 = int_to_ptr.vmem [resolvable:$true] %s566_s1 }
   0xf   :  { %v104_v10 = vmul.f32 %v764_v6, %v764_v6  ;;  %v778_v13 = vld [vmem:[#allocation7 + $0x30] sm:$0xff]  ;;  %v65_v14 = vsel %vm48_vm0, %v62_v3, 0.0  ;;  %v254_v16 = vld [vmem:[#allocation7 + $0x38] sm:$0xff]  ;;  %v255_v17 = vmul.f32 %v774_v11, %v774_v11  ;;  %v256_v21 = vmul.f32 %v776_v12, %v776_v12 }
  0x10   :  { %v106_v15 = vsel %vm105_vm1, %v101_v7, 0.0  ;;  %66 = vadd.xlane.f32.xlu0 %v65_v14  ;;  %v107_v19 = vsel %vm105_vm1, %v102_v8, 0.0  ;;  %v109_v20 = vsel %vm105_vm1, %v103_v9, 0.0  ;;  %v257_v23 = vmul.f32 %v778_v13, %v778_v13 }
  0x11   :  { %v108_v22 = vadd.f32 %v107_v19, %v106_v15  ;;  %v258_v24 = vmul.f32 %v254_v16, %v254_v16  ;;  %v259_v25 = vsel %vm105_vm1, %v255_v17, 0.0  ;;  %v111_v26 = vsel %vm105_vm1, %v104_v10, 0.0 }
  0x12   :  { %v260_v27 = vsel %vm105_vm1, %v256_v21, 0.0  ;;  %v262_v30 = vsel %vm105_vm1, %v257_v23, 0.0  ;;  %v68_v32 = vsel %vm48_vm0, %v63_v18, 0.0  ;;  %v60_v17 = vmul.f32 200.0, %v752_v0 }
  0x13   :  { %v110_v28 = vadd.f32 %v109_v20, %v108_v22  ;;  %v261_v29 = vadd.f32 %v260_v27, %v259_v25  ;;  %v264_v31 = vsel %vm105_vm1, %v258_v24, 0.0 }
  0x15   :  { %v112_v33 = vadd.f32 %v111_v26, %v110_v28  ;;  %v263_v34 = vadd.f32 %v262_v30, %v261_v29 }
  0x17   :  { %v113_v35 = vrot.slane %v112_v33, 4  ;;  %v265_v36 = vadd.f32 %v264_v31, %v263_v34 }
  0x18   :  { %69 = vadd.xlane.f32.xlu0 %v68_v32 }
  0x19   :  { %v114_v37 = vadd.f32 %v113_v35, %v112_v33  ;;  %v266_v38 = vrot.slane %v265_v36, 4 }
  0x1b   :  { %v115_v39 = vrot.slane %v114_v37, 2  ;;  %v267_v40 = vadd.f32 %v266_v38, %v265_v36 }
  0x1d   :  { %v116_v41 = vadd.f32 %v115_v39, %v114_v37  ;;  %v268_v42 = vrot.slane %v267_v40, 2 }
  0x1f   :  { %v117_v43 = vrot.slane %v116_v41, 1  ;;  %v269_v44 = vadd.f32 %v268_v42, %v267_v40 }
  0x21   :  { %v118_v45 = vadd.f32 %v117_v43, %v116_v41  ;;  %v270_v46 = vrot.slane %v269_v44, 1 }
  0x23   :  { %v119_v47 = vmax.f32 %v118_v45, 1e-24  ;;  %v271_v48 = vadd.f32 %v270_v46, %v269_v44 }
  0x25   :  { %608 = vrsqrt.f32 %v119_v47  ;;  %v272_v49 = vmax.f32 %v271_v48, 1e-24  ;;  %vm126_vm2 = vweird.f32 %v119_v47 }
  0x27   :  { %610 = vrsqrt.f32 %v272_v49  ;;  %vm279_vm4 = vweird.f32 %v272_v49 }
  0x2b   :  { %v609_v50 = vpop.eup %608 }
  0x2c   :  { %v121_v51 = vmul.f32 %v609_v50, %v119_v47  ;;  %vm127_vm3 = vweird.f32 %v609_v50 }
  0x2d   :  { %v611_v52 = vpop.eup %610  ;;  %vm128_vm6 = vmor %vm126_vm2, %vm127_vm3 }
  0x2e   :  { %v122_v53 = vmul.f32 %v609_v50, %v121_v51  ;;  %v274_v54 = vmul.f32 %v611_v52, %v272_v49  ;;  %vm280_vm5 = vweird.f32 %v611_v52 }
  0x2f   :  { %vm281_vm7 = vmor %vm279_vm4, %vm280_vm5 }
  0x30   :  { %v123_v55 = vmul.f32 0.5, %v122_v53  ;;  %v275_v56 = vmul.f32 %v611_v52, %v274_v54 }
  0x32   :  { %v124_v57 = vsub.f32 1.5, %v123_v55  ;;  %v276_v58 = vmul.f32 0.5, %v275_v56 }
  0x34   :  { %v125_v59 = vmul.f32 %v609_v50, %v124_v57  ;;  %v277_v60 = vsub.f32 1.5, %v276_v58 }
  0x36   :  { %v129_v61 = vsel %vm128_vm6, %v609_v50, %v125_v59  ;;  %v278_v62 = vmul.f32 %v611_v52, %v277_v60 }
  0x37   :  { %v133_v63 = vmul.f32 %v129_v61, %v764_v6  ;;  %v132_v3 = vmul.f32 %v129_v61, %v762_v5  ;;  %v131_v10 = vmul.f32 %v129_v61, %v760_v4  ;;  %v130_v15 = vmul.f32 %v129_v61, %v756_v2 }
  0x38   :  { %v282_v7 = vsel %vm281_vm7, %v611_v52, %v278_v62  ;;  %v61_v2 = vmul.f32 200.0, %v754_v1 }
  0x39   :  { %152 = vmatpush.msra.mxu0 %v133_v63  ;;  %v286_v8 = vmul.f32 %v282_v7, %v254_v16  ;;  %v285_v9 = vmul.f32 %v282_v7, %v778_v13  ;;  %584 = vmatpush.xpose.msk.msra.mxu1 %vm105_vm1, %v133_v63  ;;  %v284_v14 = vmul.f32 %v282_v7, %v776_v12 }
  0x3a   :  { %v283_v5 = vmul.f32 %v282_v7, %v774_v11 }
  0x3b   :  { %299 = vmatpush.msra.mxu2 %v286_v8  ;;  %153 = vmatpush.msra.mxu0 %v132_v3 }
  0x3c   :  { %592 = vmatpush.xpose.msk.msra.mxu3 %vm105_vm1, %v286_v8 }
  0x3d   :  { %300 = vmatpush.msra.mxu2 %v285_v9  ;;  %154 = vmatpush.msra.mxu0 %v131_v10 }
  0x3e   :  { %585 = vmatpush.xpose.msk.msra.mxu1 %vm105_vm1, %v132_v3 }
  0x3f   :  { %301 = vmatpush.msra.mxu2 %v284_v14  ;;  %155 = vmatpush.msra.mxu0 %v130_v15 }
  0x40   :  { %582 = vmatmul.msk.f32.vlgmr.msra.gmra.mxu0 %vm48_vm0, %v60_v17  ;;  %593 = vmatpush.xpose.msk.msra.mxu3 %vm105_vm1, %v285_v9 }
  0x41   :  { %302 = vmatpush.msra.mxu2 %v283_v5 }
  0x42   :  { %590 = vmatmul.msk.f32.vlgmr.msra.gmra.mxu2 %vm48_vm0, %v60_v17  ;;  %586 = vmatpush.xpose.msk.msra.mxu1 %vm105_vm1, %v131_v10 }
  0x44   :  { %594 = vmatpush.xpose.msk.msra.mxu3 %vm105_vm1, %v284_v14 }
  0x46   :  { %587 = vmatpush.xpose.msk.msra.mxu1 %vm105_vm1, %v130_v15 }
  0x48   :  { %583 = vmatmul.msk.f32.gmra.mxu0 %vm48_vm0, %v61_v2  ;;  %595 = vmatpush.xpose.msk.msra.mxu3 %vm105_vm1, %v283_v5 }
  0x4a   :  { %591 = vmatmul.msk.f32.gmra.mxu2 %vm48_vm0, %v61_v2 }
  0x83   :  { %v67_v4 = vpop.xlane.xlu0 %66 }
  0x84   :  { %612 = vrsqrt.f32 %v67_v4  ;;  %vm78_vm8 = vcmp.eq.f32.partialorder %v67_v4, inf  ;;  %v81_v28 = vand.u32 2147483648, %v67_v4  ;;  %vm80_vm10 = vcmp.eq.f32.partialorder %v67_v4, 0.0 }
  0x8a   :  { %v613_v11 = vpop.eup %612 }
  0x8b   :  { %v70_v6 = vpop.xlane.xlu0 %69  ;;  %v72_v13 = vmul.f32 %v613_v11, %v67_v4 }
  0x8c   :  { %614 = vrsqrt.f32 %v70_v6  ;;  %vm90_vm9 = vcmp.eq.f32.partialorder %v70_v6, inf  ;;  %v93_v31 = vand.u32 2147483648, %v70_v6  ;;  %vm92_vm11 = vcmp.eq.f32.partialorder %v70_v6, 0.0 }
  0x8d   :  { %v73_v18 = vmul.f32 %v613_v11, %v72_v13 }
  0x8f   :  { %v74_v20 = vmul.f32 0.5, %v73_v18 }
  0x91   :  { %v75_v22 = vsub.f32 1.5, %v74_v20 }
  0x92   :  { %v615_v12 = vpop.eup %614 }
  0x93   :  { %v84_v16 = vmul.f32 %v615_v12, %v70_v6  ;;  %v76_v24 = vmul.f32 %v613_v11, %v75_v22  ;;  %v722_v22 = vmov 0.0  }
  0x94   :  { %54 = vst.msk [vmem:[#allocation3] sm:$0xff] %vm53_vm12, %v722_v22 }
  0x95   :  { %v85_v19 = vmul.f32 %v615_v12, %v84_v16  ;;  %v77_v26 = vmul.f32 %v76_v24, %v67_v4  ;;  %49 = vst.msk [vmem:[#allocation2] sm:$0xff] %vm48_vm0, %v722_v22 }
  0x96   :  { %50 = vst.msk [vmem:[#allocation2 + $0x8] sm:$0xff] %vm48_vm0, %v722_v22 }
  0x97   :  { %v86_v21 = vmul.f32 0.5, %v85_v19  ;;  %v79_v29 = vsel %vm78_vm8, %v67_v4, %v77_v26  ;;  %51 = vst.msk [vmem:[#allocation2 + $0x10] sm:$0xff] %vm48_vm0, %v722_v22 }
  0x98   :  { %v82_v33 = vsel %vm80_vm10, %v81_v28, %v79_v29  ;;  %52 = vst.msk [vmem:[#allocation2 + $0x18] sm:$0xff] %vm48_vm0, %v722_v22 }
  0x99   :  { %v87_v23 = vsub.f32 1.5, %v86_v21  ;;  %v95_v35 = vmul.f32 -100.0, %v82_v33  ;;  %55 = vst.msk [vmem:[#allocation3 + $0x8] sm:$0xff] %vm53_vm12, %v722_v22 }
  0x9a   :  { %56 = vst.msk [vmem:[#allocation3 + $0x10] sm:$0xff] %vm53_vm12, %v722_v22 }
  0x9b   :  { %v88_v25 = vmul.f32 %v615_v12, %v87_v23  ;;  %57 = vst.msk [vmem:[#allocation3 + $0x18] sm:$0xff] %vm53_vm12, %v722_v22 }
  0x9d   :  { %v89_v27 = vmul.f32 %v88_v25, %v70_v6 }
  0x9f   :  { %v91_v32 = vsel %vm90_vm9, %v70_v6, %v89_v27 }
  0xa0   :  { %v94_v34 = vsel %vm92_vm11, %v93_v31, %v91_v32 }
  0xa1   :  { %v96_v37 = vmul.f32 -100.0, %v94_v34 }
  0xbd   :  { %v157_v30 = vpop.f32.mrf.mxu0 }
  0xbe   :  { %v158_v36 = vadd.f32 %v157_v30, %v95_v35 }
  0xc0   :  { %v163_v41 = vsel %vm105_vm1, %v158_v36, -inf }
  0xc5   :  { %v304_v38 = vpop.f32.mrf.mxu2  ;;  %v160_v39 = vpop.f32.mrf.mxu0 }
  0xc6   :  { %v161_v40 = vadd.f32 %v160_v39, %v96_v37  ;;  %v305_v45 = vadd.f32 %v304_v38, %v95_v35 }
  0xc8   :  { %v164_v42 = vsel %vm105_vm1, %v161_v40, -inf  ;;  %v310_v50 = vsel %vm105_vm1, %v305_v45, -inf }
  0xc9   :  { %v165_v43 = vmax.f32 %v163_v41, %v164_v42  ;;  %v723_v41 = vmov 0   ;;  %v237_v42 = vld [vmem:[#allocation3] sm:$0xff] }
  0xca   :  { %605 = vset.pattern.permute.xlu0 %v723_v41  ;;  %607 = vset.pattern.permute.xlu2 %v723_v41 }
  0xcb   :  { %v166_v44 = vrot.slane %v165_v43, 4  ;;  %606 = vset.pattern.permute.xlu1 %v723_v41 }
  0xcd   :  { %v167_v46 = vmax.f32 %v165_v43, %v166_v44  ;;  %v307_v47 = vpop.f32.mrf.mxu2 }
  0xce   :  { %v308_v48 = vadd.f32 %v307_v47, %v96_v37  ;;  %v190_v47 = vld [vmem:[#allocation2] sm:$0xff] }
  0xcf   :  { %v168_v49 = vrot.slane %v167_v46, 2 }
  0xd0   :  { %v311_v51 = vsel %vm105_vm1, %v308_v48, -inf }
  0xd1   :  { %v169_v52 = vmax.f32 %v167_v46, %v168_v49  ;;  %v312_v53 = vmax.f32 %v310_v50, %v311_v51  ;;  %v238_v46 = vld [vmem:[#allocation3 + $0x8] sm:$0xff] }
  0xd3   :  { %v170_v54 = vrot.slane %v169_v52, 1  ;;  %v313_v55 = vrot.slane %v312_v53, 4 }
  0xd5   :  { %v171_v56 = vmax.f32 %v169_v52, %v170_v54  ;;  %v314_v57 = vmax.f32 %v312_v53, %v313_v55  ;;  %v387_v55 = vld [vmem:[#allocation3 + $0x18] sm:$0xff] }
  0xd7   :  { %v172_v58 = vsub.f32 %v158_v36, %v171_v56  ;;  %v173_v59 = vsub.f32 %v161_v40, %v171_v56  ;;  %v315_v60 = vrot.slane %v314_v57, 2  ;;  %v191_v56 = vld [vmem:[#allocation2 + $0x8] sm:$0xff] }
  0xd9   :  { %v174_v61 = vmul.f32 1.442695, %v172_v58  ;;  %v176_v62 = vmul.f32 1.442695, %v173_v59  ;;  %v316_v63 = vmax.f32 %v314_v57, %v315_v60 }
  0xdb   :  { %616 = vpow2.f32 %v174_v61  ;;  %v317_v3 = vrot.slane %v316_v63, 1 }
  0xdc   :  { %618 = vpow2.f32 %v176_v62 }
  0xdd   :  { %v318_v7 = vmax.f32 %v316_v63, %v317_v3  ;;  %v338_v63 = vld [vmem:[#allocation2 + $0x10] sm:$0xff] }
  0xdf   :  { %v319_v8 = vsub.f32 %v305_v45, %v318_v7  ;;  %v320_v9 = vsub.f32 %v308_v48, %v318_v7  ;;  %v386_v45 = vld [vmem:[#allocation3 + $0x10] sm:$0xff] }
  0xe1   :  { %v617_v10 = vpop.eup %616  ;;  %v321_v14 = vmul.f32 1.442695, %v319_v8  ;;  %v323_v15 = vmul.f32 1.442695, %v320_v9  ;;  %v339_v9 = vld [vmem:[#allocation2 + $0x18] sm:$0xff] }
  0xe2   :  { %v619_v17 = vpop.eup %618  ;;  %v178_v5 = vsel %vm105_vm1, %v617_v10, 0.0 }
  0xe3   :  { %v179_v2 = vsel %vm105_vm1, %v619_v17, 0.0  ;;  %620 = vpow2.f32 %v321_v14 }
  0xe4   :  { %v180_v4 = vadd.f32 %v179_v2, %v178_v5  ;;  %622 = vpow2.f32 %v323_v15 }
  0xe6   :  { %v181_v6 = vrot.slane %v180_v4, 4 }
  0xe8   :  { %v182_v11 = vadd.f32 %v181_v6, %v180_v4 }
  0xe9   :  { %v621_v12 = vpop.eup %620 }
  0xea   :  { %v623_v13 = vpop.eup %622  ;;  %v325_v16 = vsel %vm105_vm1, %v621_v12, 0.0  ;;  %v183_v18 = vrot.slane %v182_v11, 2 }
  0xeb   :  { %v326_v19 = vsel %vm105_vm1, %v623_v13, 0.0 }
  0xec   :  { %v327_v20 = vadd.f32 %v326_v19, %v325_v16  ;;  %v184_v21 = vadd.f32 %v183_v18, %v182_v11 }
  0xee   :  { %v328_v23 = vrot.slane %v327_v20, 4  ;;  %v185_v24 = vrot.slane %v184_v21, 1 }
  0xf0   :  { %v329_v25 = vadd.f32 %v328_v23, %v327_v20  ;;  %v186_v26 = vadd.f32 %v185_v24, %v184_v21 }
  0xf2   :  { %624 = vrcp.f32 %v186_v26  ;;  %v330_v27 = vrot.slane %v329_v25, 2 }
  0xf4   :  { %v331_v28 = vadd.f32 %v330_v27, %v329_v25 }
  0xf6   :  { %v332_v29 = vrot.slane %v331_v28, 1 }
  0xf8   :  { %v625_v30 = vpop.eup %624  ;;  %v333_v31 = vadd.f32 %v332_v29, %v331_v28 }
  0xf9   :  { %v188_v32 = vmul.f32 %v625_v30, %v617_v10  ;;  %v189_v34 = vmul.f32 %v625_v30, %v619_v17 }
  0xfa   :  { %626 = vrcp.f32 %v333_v31 }
  0xfb   :  { %588 = vmatmul.msk.f32.vlgmr.msra.gmra.mxu1 %vm105_vm1, %v188_v32  ;;  %v239_v33 = vsel %vm105_vm1, %v188_v32, 0.0  ;;  %v242_v38 = vsel %vm105_vm1, %v189_v34, 0.0 }
  0xfc   :  { %240 = vadd.xlane.f32.xlu1 %v239_v33 }
 0x100   :  { %v627_v35 = vpop.eup %626 }
 0x101   :  { %v335_v36 = vmul.f32 %v627_v35, %v621_v12  ;;  %v336_v39 = vmul.f32 %v627_v35, %v623_v13 }
 0x103   :  { %596 = vmatmul.msk.f32.vlgmr.msra.gmra.mxu3 %vm105_vm1, %v335_v36  ;;  %v388_v37 = vsel %vm105_vm1, %v335_v36, 0.0  ;;  %589 = vmatmul.msk.f32.gmra.mxu1 %vm105_vm1, %v189_v34  ;;  %v391_v40 = vsel %vm105_vm1, %v336_v39, 0.0 }
 0x104   :  { %389 = vadd.xlane.f32.xlu2 %v388_v37  ;;  %243 = vadd.xlane.f32.xlu1 %v242_v38 }
 0x10b   :  { %597 = vmatmul.msk.f32.gmra.mxu3 %vm105_vm1, %v336_v39 }
 0x10c   :  { %392 = vadd.xlane.f32.xlu2 %v391_v40 }
 0x16f   :  { %v241_v43 = vpop.xlane.xlu1 %240 }
 0x170   :  { %v245_v44 = vadd.f32 %v241_v43, %v237_v42 }
 0x172   :  { %248 = vst.msk [vmem:[#allocation3] sm:$0xff] %vm53_vm12, %v245_v44 }
 0x177   :  { %v390_v48 = vpop.xlane.xlu2 %389  ;;  %v244_v49 = vpop.xlane.xlu1 %243 }
 0x178   :  { %v394_v50 = vadd.f32 %v390_v48, %v386_v45  ;;  %v246_v51 = vadd.f32 %v244_v49, %v238_v46  ;;  %v227_v52 = vpop.f32.mrf.mxu1 }
 0x179   :  { %v233_v53 = vadd.f32 %v227_v52, %v190_v47  ;;  %v403_v54 = vld [vmem:[#allocation3] sm:$0xff] }
 0x17a   :  { %396 = vst.msk [vmem:[#allocation3 + $0x10] sm:$0xff] %vm53_vm12, %v394_v50  ;;  %407 = vperm.xlu0 %605, %v403_v54  }
 0x17b   :  { %249 = vst.msk [vmem:[#allocation3 + $0x8] sm:$0xff] %vm53_vm12, %v246_v51 }
 0x17c   :  { %235 = vst.msk [vmem:[#allocation2] sm:$0xff] %vm48_vm0, %v233_v53 }
 0x17f   :  { %v393_v57 = vpop.xlane.xlu2 %392 }
 0x180   :  { %v395_v58 = vadd.f32 %v393_v57, %v387_v55  ;;  %v230_v59 = vpop.f32.mrf.mxu1 }
 0x181   :  { %v234_v60 = vadd.f32 %v230_v59, %v191_v56  ;;  %v483_v61 = vld [vmem:[#allocation3 + $0x10] sm:$0xff] }
 0x182   :  { %397 = vst.msk [vmem:[#allocation3 + $0x18] sm:$0xff] %vm53_vm12, %v395_v58  ;;  %487 = vperm.xlu2 %607, %v483_v61   ;;  %v404_v62 = vld [vmem:[#allocation3 + $0x8] sm:$0xff] }
 0x183   :  { %236 = vst.msk [vmem:[#allocation2 + $0x8] sm:$0xff] %vm48_vm0, %v234_v60  ;;  %412 = vperm.xlu1 %606, %v404_v62   ;;  %v401_v16 = vld [vmem:[#allocation2] sm:$0xff] }
 0x186   :  { %v375_v3 = vpop.f32.mrf.mxu3 }
 0x187   :  { %v381_v7 = vadd.f32 %v375_v3, %v338_v63 }
 0x189   :  { %383 = vst.msk [vmem:[#allocation2 + $0x10] sm:$0xff] %vm48_vm0, %v381_v7  ;;  %v484_v8 = vld [vmem:[#allocation3 + $0x18] sm:$0xff] }
 0x18a   :  { %492 = vperm.xlu2 %607, %v484_v8   ;;  %v402_v26 = vld [vmem:[#allocation2 + $0x8] sm:$0xff] }
 0x18e   :  { %v378_v10 = vpop.f32.mrf.mxu3 }
 0x18f   :  { %v382_v14 = vadd.f32 %v378_v10, %v339_v9 }
 0x190   :  { %v481_v5 = vld [vmem:[#allocation2 + $0x10] sm:$0xff] }
 0x191   :  { %384 = vst.msk [vmem:[#allocation2 + $0x18] sm:$0xff] %vm48_vm0, %v382_v14 }
 0x198   :  { %v482_v21 = vld [vmem:[#allocation2 + $0x18] sm:$0xff] }
 0x1dc   :  { %v488_v15 = vpop.permute.xlu2 %487 }
 0x1dd   :  { %v495_v17 = vmul.f32 %v488_v15, %v752_v0 }
 0x1df   :  { %v852_v2 = vsub.f32 %v481_v5, %v495_v17 }
 0x1e1   :  { %v499_v4 = vmul.f32 %v852_v2, %v852_v2 }
 0x1e3   :  { %v501_v6 = vsel %vm48_vm0, %v499_v4, 0.0 }
 0x1e4   :  { %502 = vadd.xlane.f32.xlu0 %v501_v6  ;;  %v493_v11 = vpop.permute.xlu2 %492 }
 0x1e5   :  { %v496_v18 = vmul.f32 %v493_v11, %v754_v1 }
 0x1e7   :  { %v859_v22 = vsub.f32 %v482_v21, %v496_v18 }
 0x1e9   :  { %v500_v27 = vmul.f32 %v859_v22, %v859_v22 }
 0x1eb   :  { %v504_v29 = vsel %vm48_vm0, %v500_v27, 0.0 }
 0x1ec   :  { %v408_v12 = vpop.permute.xlu0 %407 }
 0x1ed   :  { %v415_v13 = vmul.f32 %v408_v12, %v752_v0 }
 0x1ef   :  { %v417_v19 = vsub.f32 %v401_v16, %v415_v13 }
 0x1f1   :  { %v419_v20 = vmul.f32 %v417_v19, %v417_v19 }
 0x1f3   :  { %v421_v23 = vsel %vm48_vm0, %v419_v20, 0.0 }
 0x1f4   :  { %422 = vadd.xlane.f32.xlu1 %v421_v23 }
 0x1f5   :  { %v413_v24 = vpop.permute.xlu1 %412 }
 0x1f6   :  { %v416_v25 = vmul.f32 %v413_v24, %v754_v1 }
 0x1f8   :  { %v865_v28 = vsub.f32 %v402_v26, %v416_v25 }
 0x1fa   :  { %v420_v0 = vmul.f32 %v865_v28, %v865_v28 }
 0x1fc   :  { %v424_v30 = vsel %vm48_vm0, %v420_v0, 0.0  ;;  %505 = vadd.xlane.f32.xlu1 %v504_v29 }
 0x1fd   :  { %425 = vadd.xlane.f32.xlu2 %v424_v30 }
 0x257   :  { %v503_v31 = vpop.xlane.xlu0 %502 }
 0x258   :  { %v507_v32 = vmax.f32 %v503_v31, 1e-24 }
 0x25a   :  { %628 = vrsqrt.f32 %v507_v32  ;;  %vm515_vm2 = vweird.f32 %v507_v32 }
 0x260   :  { %v629_v33 = vpop.eup %628 }
 0x261   :  { %v510_v35 = vmul.f32 %v629_v33, %v507_v32  ;;  %vm516_vm14 = vweird.f32 %v629_v33 }
 0x262   :  { %vm517_vm3 = vmor %vm515_vm2, %vm516_vm14 }
 0x263   :  { %v511_v36 = vmul.f32 %v629_v33, %v510_v35 }
 0x265   :  { %v512_v41 = vmul.f32 0.5, %v511_v36 }
 0x267   :  { %v423_v1 = vpop.xlane.xlu1 %422  ;;  %v513_v45 = vsub.f32 1.5, %v512_v41 }
 0x268   :  { %v427_v34 = vmax.f32 %v423_v1, 1e-24 }
 0x269   :  { %v514_v52 = vmul.f32 %v629_v33, %v513_v45 }
 0x26a   :  { %630 = vrsqrt.f32 %v427_v34  ;;  %vm435_vm15 = vweird.f32 %v427_v34 }
 0x26b   :  { %v518_v59 = vsel %vm517_vm3, %v629_v33, %v514_v52 }
 0x26c   :  { %v529_v7 = vmul.f32 %v518_v59, %v852_v2 }
 0x26e   :  { %v531_v15 = vmul.f32 %v529_v7, %v529_v7 }
 0x26f   :  { %v506_v37 = vpop.xlane.xlu1 %505 }
 0x270   :  { %v631_v38 = vpop.eup %630  ;;  %v426_v39 = vpop.xlane.xlu2 %425  ;;  %v508_v40 = vmax.f32 %v506_v37, 1e-24  ;;  %v533_v11 = vsel %vm48_vm0, %v531_v15, 0.0 }
 0x271   :  { %v430_v42 = vmul.f32 %v631_v38, %v427_v34  ;;  %v428_v43 = vmax.f32 %v426_v39, 1e-24  ;;  %vm436_vm13 = vweird.f32 %v631_v38 }
 0x272   :  { %632 = vrsqrt.f32 %v508_v40  ;;  %vm437_vm1 = vmor %vm435_vm15, %vm436_vm13  ;;  %vm525_vm6 = vweird.f32 %v508_v40 }
 0x273   :  { %v431_v44 = vmul.f32 %v631_v38, %v430_v42  ;;  %634 = vrsqrt.f32 %v428_v43  ;;  %vm445_vm7 = vweird.f32 %v428_v43 }
 0x275   :  { %v432_v46 = vmul.f32 0.5, %v431_v44 }
 0x277   :  { %v433_v47 = vsub.f32 1.5, %v432_v46 }
 0x278   :  { %v633_v48 = vpop.eup %632 }
 0x279   :  { %v635_v49 = vpop.eup %634  ;;  %v520_v50 = vmul.f32 %v633_v48, %v508_v40  ;;  %v434_v51 = vmul.f32 %v631_v38, %v433_v47  ;;  %vm526_vm4 = vweird.f32 %v633_v48 }
 0x27a   :  { %v440_v53 = vmul.f32 %v635_v49, %v428_v43  ;;  %vm446_vm5 = vweird.f32 %v635_v49  ;;  %vm527_vm8 = vmor %vm525_vm6, %vm526_vm4 }
 0x27b   :  { %v521_v54 = vmul.f32 %v633_v48, %v520_v50  ;;  %v438_v55 = vsel %vm437_vm1, %v631_v38, %v434_v51  ;;  %vm447_vm9 = vmor %vm445_vm7, %vm446_vm5 }
 0x27c   :  { %v441_v56 = vmul.f32 %v635_v49, %v440_v53  ;;  %v871_v57 = vmul.f32 %v438_v55, %v417_v19 }
 0x27d   :  { %v522_v58 = vmul.f32 0.5, %v521_v54 }
 0x27e   :  { %v442_v60 = vmul.f32 0.5, %v441_v56  ;;  %v451_v61 = vmul.f32 %v871_v57, %v871_v57 }
 0x27f   :  { %v523_v62 = vsub.f32 1.5, %v522_v58 }
 0x280   :  { %v443_v63 = vsub.f32 1.5, %v442_v60  ;;  %v453_v3 = vsel %vm48_vm0, %v451_v61, 0.0 }
 0x281   :  { %454 = vadd.xlane.f32.xlu2 %v453_v3  ;;  %v524_v8 = vmul.f32 %v633_v48, %v523_v62 }
 0x282   :  { %v444_v9 = vmul.f32 %v635_v49, %v443_v63 }
 0x283   :  { %v528_v10 = vsel %vm527_vm8, %v633_v48, %v524_v8 }
 0x284   :  { %v448_v14 = vsel %vm447_vm9, %v635_v49, %v444_v9  ;;  %v530_v17 = vmul.f32 %v528_v10, %v859_v22 }
 0x285   :  { %v450_v5 = vmul.f32 %v448_v14, %v865_v28 }
 0x286   :  { %v532_v4 = vmul.f32 %v530_v17, %v530_v17 }
 0x287   :  { %v452_v6 = vmul.f32 %v450_v5, %v450_v5 }
 0x288   :  { %v536_v2 = vsel %vm48_vm0, %v532_v4, 0.0 }
 0x289   :  { %v456_v12 = vsel %vm48_vm0, %v452_v6, 0.0  ;;  %534 = vadd.xlane.f32.xlu2 %v533_v11  ;;  %537 = vadd.xlane.f32.xlu0 %v536_v2 }
 0x28a   :  { %457 = vadd.xlane.f32.xlu1 %v456_v12 }
 0x2f4   :  { %v455_v13 = vpop.xlane.xlu2 %454 }
 0x2fc   :  { %v535_v16 = vpop.xlane.xlu2 %534  ;;  %v538_v18 = vpop.xlane.xlu0 %537 }
 0x2fd   :  { %v539_v19 = vadd.f32 %v538_v18, %v535_v16  ;;  %v458_v20 = vpop.xlane.xlu1 %457 }
 0x2fe   :  { %v459_v21 = vadd.f32 %v458_v20, %v455_v13 }
 0x2ff   :  { %v540_v22 = vrot.slane %v539_v19, 4 }
 0x300   :  { %v460_v23 = vrot.slane %v459_v21, 4 }
 0x301   :  { %v541_v24 = vadd.f32 %v540_v22, %v539_v19 }
 0x302   :  { %v461_v25 = vadd.f32 %v460_v23, %v459_v21 }
 0x303   :  { %v542_v26 = vrot.slane %v541_v24, 2 }
 0x304   :  { %v462_v27 = vrot.slane %v461_v25, 2 }
 0x305   :  { %v543_v28 = vadd.f32 %v542_v26, %v541_v24 }
 0x306   :  { %v463_v0 = vadd.f32 %v462_v27, %v461_v25 }
 0x307   :  { %v544_v29 = vrot.slane %v543_v28, 1 }
 0x308   :  { %v464_v30 = vrot.slane %v463_v0, 1 }
 0x309   :  { %v545_v31 = vadd.f32 %v544_v29, %v543_v28 }
 0x30a   :  { %v465_v32 = vadd.f32 %v464_v30, %v463_v0 }
 0x30b   :  { %v546_v33 = vmax.f32 %v545_v31, 1e-24 }
 0x30c   :  { %v466_v1 = vmax.f32 %v465_v32, 1e-24 }
 0x30d   :  { %636 = vrsqrt.f32 %v546_v33  ;;  %vm553_vm12 = vweird.f32 %v546_v33 }
 0x30e   :  { %638 = vrsqrt.f32 %v466_v1  ;;  %vm473_vm14 = vweird.f32 %v466_v1 }
 0x313   :  { %v637_v34 = vpop.eup %636 }
 0x314   :  { %v639_v35 = vpop.eup %638  ;;  %v548_v36 = vmul.f32 %v637_v34, %v546_v33  ;;  %vm554_vm10 = vweird.f32 %v637_v34 }
 0x315   :  { %v468_v37 = vmul.f32 %v639_v35, %v466_v1  ;;  %vm474_vm11 = vweird.f32 %v639_v35  ;;  %vm555_vm13 = vmor %vm553_vm12, %vm554_vm10 }
 0x316   :  { %v549_v38 = vmul.f32 %v637_v34, %v548_v36  ;;  %vm475_vm15 = vmor %vm473_vm14, %vm474_vm11 }
 0x317   :  { %v469_v39 = vmul.f32 %v639_v35, %v468_v37 }
 0x318   :  { %v550_v40 = vmul.f32 0.5, %v549_v38 }
 0x319   :  { %v470_v41 = vmul.f32 0.5, %v469_v39 }
 0x31a   :  { %v551_v42 = vsub.f32 1.5, %v550_v40 }
 0x31b   :  { %v471_v43 = vsub.f32 1.5, %v470_v41 }
 0x31c   :  { %v552_v44 = vmul.f32 %v637_v34, %v551_v42 }
 0x31d   :  { %v472_v45 = vmul.f32 %v639_v35, %v471_v43 }
 0x31e   :  { %v556_v46 = vsel %vm555_vm13, %v637_v34, %v552_v44 }
 0x31f   :  { %v557_v47 = vmul.f32 %v556_v46, %v529_v7  ;;  %v558_v48 = vmul.f32 %v556_v46, %v530_v17  ;;  %v476_v49 = vsel %vm475_vm15, %v639_v35, %v472_v45 }
 0x320   :  { %v477_v50 = vmul.f32 %v476_v49, %v871_v57  ;;  %v478_v51 = vmul.f32 %v476_v49, %v450_v5 }
 0x321   :  { %560 = vst.msk [vmem:[#allocation9 + $0x10] sm:$0xff] %vm48_vm0, %v557_v47 }
 0x322   :  { %561 = vst.msk [vmem:[#allocation9 + $0x18] sm:$0xff] %vm48_vm0, %v558_v48 }
 0x323   :  { %479 = vst.msk [vmem:[#allocation9] sm:$0xff] %vm48_vm0, %v477_v50 }
 0x324   :  { %480 = vst.msk [vmem:[#allocation9 + $0x8] sm:$0xff] %vm48_vm0, %v478_v51 }
 0x325   :  { %574 = dma.vmem_to_hbm [thread:$0]  %s567_s1, 512, %s569_s23, [#allocation6], %s719_s17, %s719_s17, %s720_s18  }
 0x326   :  { %716 = dma.done.wait [#allocation6], 512  }
 0x327   :  { %717 = vsyncadd [#allocation6], 4294966784 }
 0x328   :  { %579 = vsyncpa [#allocation5], 1 }
 0x329   :  { %580 = vsyncpa [#allocation8], 1 }
 0x32a   :  { %581 = vsyncpa [#allocation6], 1 }

</bundles_post_ra>
